<compile_context>
chip_gen: v6e
topology: v6e:2x2x1
jax: 0.10.0
libtpu: 0.0.40
codegen_flags: <defaults>
</compile_context>

<pallas_src>
import functools

import jax
import jax.numpy as jnp
from jax import lax
from jax.experimental import pallas as pl
from jax.experimental.pallas import tpu as pltpu


def _round_up(x, m):
    return ((x + m - 1) // m) * m


def _class_means(logits_ref, num_classes, seq_len):
    """Per-class temporal means from a (Bt, T*C) lane-dense block.

    Returns a list of C (Bt, 1) float32 columns: col[c][r] = mean_t logits[r, t, c].
    Streams the block per 128-lane tile so no block-sized f32 temporary is
    materialized (input may be bf16 in VMEM).
    """
    bt, tc = logits_ref.shape
    C = num_classes
    n_full = tc // 128
    rem = tc - n_full * 128

    def masked_cols(slab, base_lane):
        w = slab.shape[1]
        lane_class = (base_lane + lax.broadcasted_iota(jnp.int32, (bt, w), 1)) % C
        return [jnp.sum(jnp.where(lane_class == c, slab, 0.0), axis=-1, keepdims=True)
                for c in range(C)]

    cols = [jnp.zeros((bt, 1), jnp.float32) for _ in range(C)]

    if n_full > 0:
        if 128 % C == 0:
            # class(j) = j % C is identical in every 128-lane tile -> fold tiles
            # with plain VPU adds first (1 add/elem), mask only the folded slab.
            folded = logits_ref[:, pl.ds(0, 128)].astype(jnp.float32)
            for j in range(1, n_full):
                folded = folded + logits_ref[:, pl.ds(j * 128, 128)].astype(jnp.float32)
            part = masked_cols(folded, 0)
        else:
            # TODO(synk): for C that does not divide 128 this per-tile masked path
            # is VPU-heavier; an MXU matmul against a (T*C, C) indicator could
            # cover that case.
            part = [jnp.zeros((bt, 1), jnp.float32) for _ in range(C)]
            for j in range(n_full):
                tile = logits_ref[:, pl.ds(j * 128, 128)].astype(jnp.float32)
                part = [a + b for a, b in zip(part, masked_cols(tile, j * 128))]
        cols = [a + b for a, b in zip(cols, part)]

    if rem > 0:
        tile = logits_ref[:, pl.ds(n_full * 128, rem)].astype(jnp.float32)
        cols = [a + b for a, b in zip(cols, masked_cols(tile, n_full * 128))]

    inv_t = jnp.float32(1.0 / seq_len)
    return [c_ * inv_t for c_ in cols]


def _weighted_ce_kernel(labels_ref, weights_ref, logits_ref, part_ref,
                        *, num_classes, seq_len, num_valid, block_b):
    """One grid step: one batch tile -> one (num, den) partial.

    labels_ref : (Bt, 1)     int32 VMEM   (blocked over batch)
    weights_ref: (C,)        f32   SMEM   (class weights, resident)
    logits_ref : (Bt, T*C)   native VMEM  (lane-dense view of (B, T, C))
    part_ref   : (1, 8, 128) f32   VMEM   (this block's partial: [0,0,0]=num, [0,0,1]=den)
    """
    C = num_classes
    bt = logits_ref.shape[0]
    blk = pl.program_id(0)

    cols = _class_means(logits_ref, C, seq_len)          # C x (Bt, 1) f32

    # Numerically stable log-softmax pieces over the (tiny, static) class axis.
    m = cols[0]
    for c in range(1, C):
        m = jnp.maximum(m, cols[c])

    labels = labels_ref[...]                              # (Bt, 1) int32
    sumexp = jnp.zeros((bt, 1), jnp.float32)
    pred_y = jnp.zeros((bt, 1), jnp.float32)
    w_y = jnp.zeros((bt, 1), jnp.float32)
    for c in range(C):
        sumexp = sumexp + jnp.exp(cols[c] - m)
        sel = labels == c
        pred_y = pred_y + jnp.where(sel, cols[c], 0.0)
        w_y = w_y + jnp.where(sel, weights_ref[c], 0.0)   # scalar SMEM read, broadcast
    nll = (m - pred_y) + jnp.log(sumexp)                  # (Bt, 1) = -log_softmax(pred)[y]

    # Mask rows past the true batch size (ragged last block reads garbage rows);
    # mask the whole per-row contribution so NaN/Inf from garbage cannot leak.
    row = blk * block_b + lax.broadcasted_iota(jnp.int32, (bt, 1), 0)
    valid = row < num_valid
    num = jnp.sum(jnp.where(valid, w_y * nll, 0.0))
    den = jnp.sum(jnp.where(valid, w_y, 0.0))

    # Disjoint per-block partial -> batch axis can be "parallel" (megacore on v7x).
    sub = lax.broadcasted_iota(jnp.int32, part_ref.shape, 1)
    lane = lax.broadcasted_iota(jnp.int32, part_ref.shape, 2)
    part_ref[...] = jnp.where((sub == 0) & (lane == 0), num,
                              jnp.where((sub == 0) & (lane == 1), den, 0.0))


def weighted_cross_entropy_mean_over_time(logits, labels, class_weights,
                                          loss_weight=1.0, block_b=None):
    """logits (B, T, C) float (any dtype), labels (B,) int, class_weights (C,) f32.

    Returns loss_weight * CrossEntropyLoss(weight)(logits.mean(1), labels) as a
    scalar f32.  A single streaming Pallas kernel (grid over batch tiles)
    produces per-tile (num, den) partials; the wrapper combines them.
    """
    B, T, C = logits.shape
    itemsize = jnp.dtype(logits.dtype).itemsize
    TC = T * C

    # Metadata-only view: (B, T, C) row-major -> (B, T*C). No HBM copy, and the
    # large T*C extent sits on the 128-lane axis (lane-dense DMA).
    logits2d = jnp.reshape(logits, (B, TC))
    labels2d = labels.astype(jnp.int32).reshape(B, 1)
    weights1d = class_weights.astype(jnp.float32).reshape(C)

    # Sublane-aligned batch tile, ~8 MiB per (double-buffered) logits block:
    # big enough to amortize the ~0.35us/step grid overhead on v5e/v6e/v7x,
    # small enough that 2 buffers + temporaries fit v7x's 64 MiB physical VMEM.
    sub_align = 8 * max(1, 4 // itemsize)                 # 8 (f32) / 16 (bf16) / 32 (8-bit)
    if block_b is None:
        lane_bytes = _round_up(TC, 128) * itemsize
        block_b = max(sub_align, (8 * 1024 * 1024) // lane_bytes)
    block_b = int(max(1, block_b))
    if block_b >= B:
        block_b = B                                       # single full-batch block
    else:
        block_b = max(sub_align, (block_b // sub_align) * sub_align)
        if block_b >= B:
            block_b = B
    grid_b = pl.cdiv(B, block_b)

    kernel = functools.partial(_weighted_ce_kernel, num_classes=C, seq_len=T,
                               num_valid=B, block_b=block_b)

    blk_bytes = _round_up(block_b, sub_align) * _round_up(TC, 128) * itemsize
    vmem_limit = int(min(60 * 1024 * 1024,
                         max(16 * 1024 * 1024, 4 * blk_bytes + (2 << 20))))

    cost = pl.CostEstimate(
        flops=3 * B * TC + 16 * B * C + 8 * B,
        transcendentals=B * C + B,
        bytes_accessed=B * TC * itemsize + B * 4 + C * 4 + grid_b * 8 * 128 * 4,
    )

    partials = pl.pallas_call(
        kernel,
        out_shape=jax.ShapeDtypeStruct((grid_b, 8, 128), jnp.float32),
        grid=(grid_b,),
        in_specs=[
            pl.BlockSpec((block_b, 1), lambda b: (b, 0)),            # labels block
            pl.BlockSpec(memory_space=pltpu.SMEM),                   # class weights (C,)
            pl.BlockSpec((block_b, TC), lambda b: (b, 0)),           # logits block (native dtype)
        ],
        out_specs=pl.BlockSpec((1, 8, 128), lambda b: (b, 0, 0)),    # per-block partials
        compiler_params=pltpu.CompilerParams(
            # Disjoint per-block outputs + no resident accumulator => safe to
            # shard the batch stream across both TensorCores on v7x.
            dimension_semantics=("parallel",),
            vmem_limit_bytes=vmem_limit,
        ),
        cost_estimate=cost,
    )(labels2d, weights1d, logits2d)

    num = jnp.sum(partials[:, 0, 0])
    den = jnp.sum(partials[:, 0, 1])
    # den == 0 -> inf/nan, matching torch.nn.CrossEntropyLoss.
    return jnp.float32(loss_weight) * num / den


class SetCriterionJax:
    """JAX/Pallas port of SetCriterion.forward (fMRI vigilance prediction loss)."""

    def __init__(self, dataset_config, loss_weight_dict, class_weights=None,
                 block_b=None):
        self.dataset_config = dataset_config
        self.loss_weight_dict = loss_weight_dict
        self.class_weights = class_weights
        self.block_b = block_b
        self.loss_functions = {"loss_fmri_prediction": self.loss_fmri_prediction}

    def loss_fmri_prediction(self, outputs, targets):
        y_true = targets["vigilance_label"].reshape(-1)
        y_pred = outputs["predictions"]["vigilance_head_logits"]   # (B, T, C)
        C = y_pred.shape[-1]
        cw = (self.class_weights if self.class_weights is not None
              else jnp.ones((C,), jnp.float32))
        wt = self.loss_weight_dict.get("loss_fmri_prediction_weight", None)
        lw = float(wt) if (wt is not None and wt > 0) else 1.0
        curr = weighted_cross_entropy_mean_over_time(
            y_pred, y_true, cw, loss_weight=lw, block_b=self.block_b)
        return {"loss_fmri_prediction": curr}

    def single_output_forward(self, outputs, targets):
        losses = {}
        for f in self.loss_functions:
            loss_wt_key = f + "_weight"
            if (loss_wt_key in self.loss_weight_dict
                    and self.loss_weight_dict[loss_wt_key] > 0) or (
                    loss_wt_key not in self.loss_weight_dict):
                losses.update(self.loss_functions[f](outputs, targets))
        final_loss = 0.0
        for w in self.loss_weight_dict:
            if self.loss_weight_dict[w] > 0:
                key = w.replace("_weight", "")
                # the per-loss weight is already applied in the wrapper epilogue
                final_loss = final_loss + losses[key]
        return final_loss, losses

    def __call__(self, outputs, targets):
        return self.single_output_forward(outputs, targets)


if __name__ == "__main__":
    key = jax.random.PRNGKey(0)

    # Config 1: bf16 logits, batch grid of 2 with a ragged last tile.
    B, T, C = 20, 16, 4
    k1, k2 = jax.random.split(key)
    logits = jax.random.normal(k1, (B, T, C), dtype=jnp.float32).astype(jnp.bfloat16)
    labels = jax.random.randint(k2, (B,), 0, C, dtype=jnp.int32)
    class_weights = jnp.array([1.0, 2.0, 0.5, 1.5], dtype=jnp.float32)
    loss_weight_dict = {"loss_fmri_prediction_weight": 0.7}

    criterion = SetCriterionJax(
        dataset_config=None,
        loss_weight_dict=loss_weight_dict,
        class_weights=class_weights,
        block_b=16,   # bf16-aligned tile < B -> exercises multi-step grid + ragged masking
    )
    outputs = {"predictions": {"vigilance_head_logits": logits}}
    targets = {"vigilance_label": labels}
    final_loss, loss_dict = criterion(outputs, targets)
    final_loss = jax.block_until_ready(final_loss)
    jax.block_until_ready(loss_dict["loss_fmri_prediction"])

    pred = jnp.mean(logits.astype(jnp.float32), axis=1)
    logp = jax.nn.log_softmax(pred, axis=-1)
    nll = -jnp.take_along_axis(logp, labels[:, None], axis=-1)[:, 0]
    w = class_weights[labels]
    ref = loss_weight_dict["loss_fmri_prediction_weight"] * jnp.sum(w * nll) / jnp.sum(w)
    assert jnp.isfinite(final_loss)
    assert jnp.allclose(final_loss, ref, rtol=1e-4, atol=1e-5), (float(final_loss), float(ref))

    # Config 2: f32 logits with T*C a multiple of 128 (exercises the lane-tile
    # fold path) and default tile sizing (single full-batch block).
    B2, T2, C2 = 8, 96, 4
    k3, k4 = jax.random.split(k2)
    logits2 = jax.random.normal(k3, (B2, T2, C2), dtype=jnp.float32)
    labels2 = jax.random.randint(k4, (B2,), 0, C2, dtype=jnp.int32)
    cw2 = jnp.ones((C2,), jnp.float32)
    loss2 = weighted_cross_entropy_mean_over_time(logits2, labels2, cw2, loss_weight=1.0)
    loss2 = jax.block_until_ready(loss2)
    pred2 = jnp.mean(logits2, axis=1)
    logp2 = jax.nn.log_softmax(pred2, axis=-1)
    ref2 = jnp.mean(-jnp.take_along_axis(logp2, labels2[:, None], axis=-1)[:, 0])
    assert jnp.allclose(loss2, ref2, rtol=1e-4, atol=1e-5), (float(loss2), float(ref2))

    print("KERNEL_OK")
</pallas_src>

<mosaic_0001>
module attributes {stable_mosaic.version = 11 : i64} {
  func.func @_weighted_ce_kernel(%arg0: i32, %arg1: memref<16x1xi32, #tpu.memory_space<vmem>>, %arg2: memref<4xf32, #tpu.memory_space<smem>>, %arg3: memref<16x64xbf16, #tpu.memory_space<vmem>>, %arg4: memref<1x8x128xf32, #tpu.memory_space<vmem>>) attributes {dimension_semantics = [#tpu.dimension_semantics<parallel>], iteration_bounds = array<i64: 2>, scalar_prefetch = 0 : i64, scratch_operands = 0 : i64, tpu.core_type = #tpu.core_type<tc>, window_params = [{transform_indices = @transform_0, window_bounds = array<i64: 16, 1>}, {transform_indices = @transform_1, window_bounds = array<i64: 4>}, {transform_indices = @transform_2, window_bounds = array<i64: 16, 64>}, {transform_indices = @transform_3, window_bounds = array<i64: 1, 8, 128>}]} {
    %cst = arith.constant 0.000000e+00 : f32
    %0 = vector.broadcast %cst : f32 to vector<16x1xf32>
    %cst_0 = arith.constant 0.000000e+00 : f32
    %1 = vector.broadcast %cst_0 : f32 to vector<16x1xf32>
    %cst_1 = arith.constant 0.000000e+00 : f32
    %2 = vector.broadcast %cst_1 : f32 to vector<16x1xf32>
    %cst_2 = arith.constant 0.000000e+00 : f32
    %3 = vector.broadcast %cst_2 : f32 to vector<16x1xf32>
    %c0 = arith.constant 0 : index
    %c0_3 = arith.constant 0 : index
    %4 = vector.load %arg3[%c0, %c0_3] : memref<16x64xbf16, #tpu.memory_space<vmem>>, vector<16x64xbf16>
    %5 = arith.extf %4 : vector<16x64xbf16> to vector<16x64xf32>
    %6 = tpu.iota {dimensions = array<i32: 1>} : vector<16x64xi32>
    %c0_i32 = arith.constant 0 : i32
    %7 = vector.broadcast %c0_i32 : i32 to vector<16x64xi32>
    %8 = arith.addi %7, %6 : vector<16x64xi32>
    %c4_i32 = arith.constant 4 : i32
    %c0_i32_4 = arith.constant 0 : i32
    %9 = arith.cmpi eq, %c4_i32, %c0_i32_4 : i32
    %c1_i32 = arith.constant 1 : i32
    %10 = arith.select %9, %c1_i32, %c4_i32 : i32
    %11 = vector.broadcast %10 : i32 to vector<16x64xi32>
    %12 = arith.remsi %8, %11 : vector<16x64xi32>
    %c0_i32_5 = arith.constant 0 : i32
    %13 = vector.broadcast %c0_i32_5 : i32 to vector<16x64xi32>
    %14 = arith.cmpi ne, %12, %13 : vector<16x64xi32>
    %c0_i32_6 = arith.constant 0 : i32
    %15 = vector.broadcast %c0_i32_6 : i32 to vector<16x64xi32>
    %16 = arith.cmpi slt, %12, %15 : vector<16x64xi32>
    %c0_i32_7 = arith.constant 0 : i32
    %17 = arith.cmpi slt, %10, %c0_i32_7 : i32
    %18 = vector.broadcast %17 : i1 to vector<16x64xi1>
    %19 = vector.broadcast %18 : vector<16x64xi1> to vector<16x64xi1>
    %20 = arith.xori %16, %19 : vector<16x64xi1>
    %21 = arith.andi %20, %14 : vector<16x64xi1>
    %22 = vector.broadcast %10 : i32 to vector<16x64xi32>
    %23 = arith.addi %12, %22 : vector<16x64xi32>
    %24 = arith.select %21, %23, %12 : vector<16x64xi1>, vector<16x64xi32>
    %c0_i32_8 = arith.constant 0 : i32
    %25 = vector.broadcast %c0_i32_8 : i32 to vector<16x64xi32>
    %26 = arith.cmpi eq, %24, %25 : vector<16x64xi32>
    %cst_9 = arith.constant 0.000000e+00 : f32
    %27 = vector.broadcast %cst_9 : f32 to vector<16x64xf32>
    %28 = arith.select %26, %5, %27 : vector<16x64xi1>, vector<16x64xf32>
    %cst_10 = arith.constant dense<0.000000e+00> : vector<16xf32>
    %29 = vector.multi_reduction <add>, %28, %cst_10 [1] : vector<16x64xf32> to vector<16xf32>
    %30 = vector.shape_cast %29 : vector<16xf32> to vector<16x1xf32>
    %c1_i32_11 = arith.constant 1 : i32
    %31 = vector.broadcast %c1_i32_11 : i32 to vector<16x64xi32>
    %32 = arith.cmpi eq, %24, %31 : vector<16x64xi32>
    %cst_12 = arith.constant 0.000000e+00 : f32
    %33 = vector.broadcast %cst_12 : f32 to vector<16x64xf32>
    %34 = arith.select %32, %5, %33 : vector<16x64xi1>, vector<16x64xf32>
    %cst_13 = arith.constant dense<0.000000e+00> : vector<16xf32>
    %35 = vector.multi_reduction <add>, %34, %cst_13 [1] : vector<16x64xf32> to vector<16xf32>
    %36 = vector.shape_cast %35 : vector<16xf32> to vector<16x1xf32>
    %c2_i32 = arith.constant 2 : i32
    %37 = vector.broadcast %c2_i32 : i32 to vector<16x64xi32>
    %38 = arith.cmpi eq, %24, %37 : vector<16x64xi32>
    %cst_14 = arith.constant 0.000000e+00 : f32
    %39 = vector.broadcast %cst_14 : f32 to vector<16x64xf32>
    %40 = arith.select %38, %5, %39 : vector<16x64xi1>, vector<16x64xf32>
    %cst_15 = arith.constant dense<0.000000e+00> : vector<16xf32>
    %41 = vector.multi_reduction <add>, %40, %cst_15 [1] : vector<16x64xf32> to vector<16xf32>
    %42 = vector.shape_cast %41 : vector<16xf32> to vector<16x1xf32>
    %c3_i32 = arith.constant 3 : i32
    %43 = vector.broadcast %c3_i32 : i32 to vector<16x64xi32>
    %44 = arith.cmpi eq, %24, %43 : vector<16x64xi32>
    %cst_16 = arith.constant 0.000000e+00 : f32
    %45 = vector.broadcast %cst_16 : f32 to vector<16x64xf32>
    %46 = arith.select %44, %5, %45 : vector<16x64xi1>, vector<16x64xf32>
    %cst_17 = arith.constant dense<0.000000e+00> : vector<16xf32>
    %47 = vector.multi_reduction <add>, %46, %cst_17 [1] : vector<16x64xf32> to vector<16xf32>
    %48 = vector.shape_cast %47 : vector<16xf32> to vector<16x1xf32>
    %49 = arith.addf %0, %30 : vector<16x1xf32>
    %50 = arith.addf %1, %36 : vector<16x1xf32>
    %51 = arith.addf %2, %42 : vector<16x1xf32>
    %52 = arith.addf %3, %48 : vector<16x1xf32>
    %cst_18 = arith.constant 6.250000e-02 : f32
    %53 = vector.broadcast %cst_18 : f32 to vector<16x1xf32>
    %54 = arith.mulf %49, %53 : vector<16x1xf32>
    %cst_19 = arith.constant 6.250000e-02 : f32
    %55 = vector.broadcast %cst_19 : f32 to vector<16x1xf32>
    %56 = arith.mulf %50, %55 : vector<16x1xf32>
    %cst_20 = arith.constant 6.250000e-02 : f32
    %57 = vector.broadcast %cst_20 : f32 to vector<16x1xf32>
    %58 = arith.mulf %51, %57 : vector<16x1xf32>
    %cst_21 = arith.constant 6.250000e-02 : f32
    %59 = vector.broadcast %cst_21 : f32 to vector<16x1xf32>
    %60 = arith.mulf %52, %59 : vector<16x1xf32>
    %61 = arith.maximumf %54, %56 : vector<16x1xf32>
    %62 = arith.maximumf %61, %58 : vector<16x1xf32>
    %63 = arith.maximumf %62, %60 : vector<16x1xf32>
    %c0_22 = arith.constant 0 : index
    %c0_23 = arith.constant 0 : index
    %64 = vector.load %arg1[%c0_22, %c0_23] : memref<16x1xi32, #tpu.memory_space<vmem>>, vector<16x1xi32>
    %cst_24 = arith.constant 0.000000e+00 : f32
    %65 = vector.broadcast %cst_24 : f32 to vector<16x1xf32>
    %cst_25 = arith.constant 0.000000e+00 : f32
    %66 = vector.broadcast %cst_25 : f32 to vector<16x1xf32>
    %cst_26 = arith.constant 0.000000e+00 : f32
    %67 = vector.broadcast %cst_26 : f32 to vector<16x1xf32>
    %68 = arith.subf %54, %63 : vector<16x1xf32>
    %69 = math.exp %68 : vector<16x1xf32>
    %70 = arith.addf %65, %69 : vector<16x1xf32>
    %c0_i32_27 = arith.constant 0 : i32
    %71 = vector.broadcast %c0_i32_27 : i32 to vector<16x1xi32>
    %72 = arith.cmpi eq, %64, %71 : vector<16x1xi32>
    %cst_28 = arith.constant 0.000000e+00 : f32
    %73 = vector.broadcast %cst_28 : f32 to vector<16x1xf32>
    %74 = arith.select %72, %54, %73 : vector<16x1xi1>, vector<16x1xf32>
    %75 = arith.addf %66, %74 : vector<16x1xf32>
    %c0_29 = arith.constant 0 : index
    %76 = memref.load %arg2[%c0_29] : memref<4xf32, #tpu.memory_space<smem>>
    %cst_30 = arith.constant 0.000000e+00 : f32
    %77 = vector.broadcast %76 : f32 to vector<16x1xf32>
    %78 = vector.broadcast %cst_30 : f32 to vector<16x1xf32>
    %79 = arith.select %72, %77, %78 : vector<16x1xi1>, vector<16x1xf32>
    %80 = arith.addf %67, %79 : vector<16x1xf32>
    %81 = arith.subf %56, %63 : vector<16x1xf32>
    %82 = math.exp %81 : vector<16x1xf32>
    %83 = arith.addf %70, %82 : vector<16x1xf32>
    %c1_i32_31 = arith.constant 1 : i32
    %84 = vector.broadcast %c1_i32_31 : i32 to vector<16x1xi32>
    %85 = arith.cmpi eq, %64, %84 : vector<16x1xi32>
    %cst_32 = arith.constant 0.000000e+00 : f32
    %86 = vector.broadcast %cst_32 : f32 to vector<16x1xf32>
    %87 = arith.select %85, %56, %86 : vector<16x1xi1>, vector<16x1xf32>
    %88 = arith.addf %75, %87 : vector<16x1xf32>
    %c1 = arith.constant 1 : index
    %89 = memref.load %arg2[%c1] : memref<4xf32, #tpu.memory_space<smem>>
    %cst_33 = arith.constant 0.000000e+00 : f32
    %90 = vector.broadcast %89 : f32 to vector<16x1xf32>
    %91 = vector.broadcast %cst_33 : f32 to vector<16x1xf32>
    %92 = arith.select %85, %90, %91 : vector<16x1xi1>, vector<16x1xf32>
    %93 = arith.addf %80, %92 : vector<16x1xf32>
    %94 = arith.subf %58, %63 : vector<16x1xf32>
    %95 = math.exp %94 : vector<16x1xf32>
    %96 = arith.addf %83, %95 : vector<16x1xf32>
    %c2_i32_34 = arith.constant 2 : i32
    %97 = vector.broadcast %c2_i32_34 : i32 to vector<16x1xi32>
    %98 = arith.cmpi eq, %64, %97 : vector<16x1xi32>
    %cst_35 = arith.constant 0.000000e+00 : f32
    %99 = vector.broadcast %cst_35 : f32 to vector<16x1xf32>
    %100 = arith.select %98, %58, %99 : vector<16x1xi1>, vector<16x1xf32>
    %101 = arith.addf %88, %100 : vector<16x1xf32>
    %c2 = arith.constant 2 : index
    %102 = memref.load %arg2[%c2] : memref<4xf32, #tpu.memory_space<smem>>
    %cst_36 = arith.constant 0.000000e+00 : f32
    %103 = vector.broadcast %102 : f32 to vector<16x1xf32>
    %104 = vector.broadcast %cst_36 : f32 to vector<16x1xf32>
    %105 = arith.select %98, %103, %104 : vector<16x1xi1>, vector<16x1xf32>
    %106 = arith.addf %93, %105 : vector<16x1xf32>
    %107 = arith.subf %60, %63 : vector<16x1xf32>
    %108 = math.exp %107 : vector<16x1xf32>
    %109 = arith.addf %96, %108 : vector<16x1xf32>
    %c3_i32_37 = arith.constant 3 : i32
    %110 = vector.broadcast %c3_i32_37 : i32 to vector<16x1xi32>
    %111 = arith.cmpi eq, %64, %110 : vector<16x1xi32>
    %cst_38 = arith.constant 0.000000e+00 : f32
    %112 = vector.broadcast %cst_38 : f32 to vector<16x1xf32>
    %113 = arith.select %111, %60, %112 : vector<16x1xi1>, vector<16x1xf32>
    %114 = arith.addf %101, %113 : vector<16x1xf32>
    %c3 = arith.constant 3 : index
    %115 = memref.load %arg2[%c3] : memref<4xf32, #tpu.memory_space<smem>>
    %cst_39 = arith.constant 0.000000e+00 : f32
    %116 = vector.broadcast %115 : f32 to vector<16x1xf32>
    %117 = vector.broadcast %cst_39 : f32 to vector<16x1xf32>
    %118 = arith.select %111, %116, %117 : vector<16x1xi1>, vector<16x1xf32>
    %119 = arith.addf %106, %118 : vector<16x1xf32>
    %120 = arith.subf %63, %114 : vector<16x1xf32>
    %121 = math.log %109 : vector<16x1xf32>
    %122 = arith.addf %120, %121 : vector<16x1xf32>
    %c16_i32 = arith.constant 16 : i32
    %123 = arith.muli %arg0, %c16_i32 : i32
    %124 = tpu.iota {dimensions = array<i32: 0>} : vector<16x1xi32>
    %125 = vector.broadcast %123 : i32 to vector<16x1xi32>
    %126 = arith.addi %125, %124 : vector<16x1xi32>
    %c20_i32 = arith.constant 20 : i32
    %127 = vector.broadcast %c20_i32 : i32 to vector<16x1xi32>
    %128 = arith.cmpi slt, %126, %127 : vector<16x1xi32>
    %129 = arith.mulf %119, %122 : vector<16x1xf32>
    %cst_40 = arith.constant 0.000000e+00 : f32
    %130 = vector.broadcast %cst_40 : f32 to vector<16x1xf32>
    %131 = arith.select %128, %129, %130 : vector<16x1xi1>, vector<16x1xf32>
    %132 = vector.shape_cast %131 : vector<16x1xf32> to vector<1x16x1xf32>
    %cst_41 = arith.constant dense<0.000000e+00> : vector<1xf32>
    %133 = vector.multi_reduction <add>, %132, %cst_41 [1, 2] : vector<1x16x1xf32> to vector<1xf32>
    %134 = vector.shape_cast %133 : vector<1xf32> to vector<1x1x1xf32>
    %135 = vector.extract %134[0, 0, 0] : f32 from vector<1x1x1xf32>
    %cst_42 = arith.constant 0.000000e+00 : f32
    %136 = vector.broadcast %cst_42 : f32 to vector<16x1xf32>
    %137 = arith.select %128, %119, %136 : vector<16x1xi1>, vector<16x1xf32>
    %138 = vector.shape_cast %137 : vector<16x1xf32> to vector<1x16x1xf32>
    %cst_43 = arith.constant dense<0.000000e+00> : vector<1xf32>
    %139 = vector.multi_reduction <add>, %138, %cst_43 [1, 2] : vector<1x16x1xf32> to vector<1xf32>
    %140 = vector.shape_cast %139 : vector<1xf32> to vector<1x1x1xf32>
    %141 = vector.extract %140[0, 0, 0] : f32 from vector<1x1x1xf32>
    %142 = tpu.iota {dimensions = array<i32: 1>} : vector<1x8x128xi32>
    %143 = tpu.iota {dimensions = array<i32: 2>} : vector<1x8x128xi32>
    %c0_i32_44 = arith.constant 0 : i32
    %144 = vector.broadcast %c0_i32_44 : i32 to vector<1x8x128xi32>
    %145 = arith.cmpi eq, %142, %144 : vector<1x8x128xi32>
    %c0_i32_45 = arith.constant 0 : i32
    %146 = vector.broadcast %c0_i32_45 : i32 to vector<1x8x128xi32>
    %147 = arith.cmpi eq, %143, %146 : vector<1x8x128xi32>
    %148 = arith.andi %145, %147 : vector<1x8x128xi1>
    %c0_i32_46 = arith.constant 0 : i32
    %149 = vector.broadcast %c0_i32_46 : i32 to vector<1x8x128xi32>
    %150 = arith.cmpi eq, %142, %149 : vector<1x8x128xi32>
    %c1_i32_47 = arith.constant 1 : i32
    %151 = vector.broadcast %c1_i32_47 : i32 to vector<1x8x128xi32>
    %152 = arith.cmpi eq, %143, %151 : vector<1x8x128xi32>
    %153 = arith.andi %150, %152 : vector<1x8x128xi1>
    %cst_48 = arith.constant 0.000000e+00 : f32
    %154 = vector.broadcast %141 : f32 to vector<1x8x128xf32>
    %155 = vector.broadcast %cst_48 : f32 to vector<1x8x128xf32>
    %156 = arith.select %153, %154, %155 : vector<1x8x128xi1>, vector<1x8x128xf32>
    %157 = vector.broadcast %135 : f32 to vector<1x8x128xf32>
    %158 = arith.select %148, %157, %156 : vector<1x8x128xi1>, vector<1x8x128xf32>
    %c0_49 = arith.constant 0 : index
    %c0_50 = arith.constant 0 : index
    %c0_51 = arith.constant 0 : index
    %159 = vector.load %arg4[%c0_49, %c0_50, %c0_51] : memref<1x8x128xf32, #tpu.memory_space<vmem>>, vector<1x8x128xf32>
    tpu.vector_store %arg4[%c0_49, %c0_50, %c0_51], %158 {strides = array<i32>} : memref<1x8x128xf32, #tpu.memory_space<vmem>>, vector<1x8x128xf32>,
    return
  }
  func.func @transform_0(%arg0: i32) -> (i32, i32) {
    %c0_i32 = arith.constant 0 : i32
    %c0_i32_0 = arith.constant 0 : i32
    return %arg0, %c0_i32 : i32, i32
  }
  func.func @transform_1(%arg0: i32) -> i32 {
    %c0_i32 = arith.constant 0 : i32
    %c0_i32_0 = arith.constant 0 : i32
    return %c0_i32 : i32
  }
  func.func @transform_2(%arg0: i32) -> (i32, i32) {
    %c0_i32 = arith.constant 0 : i32
    %c0_i32_0 = arith.constant 0 : i32
    return %arg0, %c0_i32 : i32, i32
  }
  func.func @transform_3(%arg0: i32) -> (i32, i32, i32) {
    %c0_i32 = arith.constant 0 : i32
    %c0_i32_0 = arith.constant 0 : i32
    %c0_i32_1 = arith.constant 0 : i32
    return %arg0, %c0_i32, %c0_i32_0 : i32, i32, i32
  }
}

</mosaic_0001>

<bundles_post_ra>
// kernel: tpu_custom_call.1
= control target key start
LH: loop header
LB: loop body
LE: loop exit
PB: predicated region body
PF: predicated region fallthrough
CT: control target
= control target key end

     0   :  { %8 = vsyncpa [#allocation4], 0  ;;  %s974_s0 = inlined_call_operand.vmem [shape: s32[20,1], index: 0, kind: input, shape index: {}]   ;;  %s975_s1 = inlined_call_operand.vmem [shape: f32[4], index: 1, kind: input, shape index: {}]   ;;  %s976_s2 = inlined_call_operand.vmem [shape: bf16[20,64], index: 2, kind: input, shape index: {}]   ;;  %s977_s3 = inlined_call_operand.hbm [shape: f32[2,8,128], index: 3, kind: output, shape index: {}]  }
   0x1   :  { %9 = vsyncpa [#allocation3], 0 }
   0x2   :  { %11 = vsyncpa [#allocation3 + $0x1], 0  ;;  %s761_s12 = smov 0   ;;  %s763_s13 = smov 0  }
   0x3   :  { %s765_s14 = smov 0   ;;  %s767_s15 = smov 0  }
   0x4 LB: > { %s782_s16 = sadd.s32 4294967295, %s737_s15   ;;  %s561_s17 = sadd.s32 4294967294, %s737_s15   ;;  %s737_s15 = sphi %s767_s15, %s984_s15   ;;  %s733_s14 = sphi %s765_s14, %s983_s14   ;;  %s729_s13 = sphi %s763_s13, %s982_s13   ;;  %s725_s12 = sphi %s761_s12, %s981_s12  }
   0x5   : > { %s786_s18 = sadd.s32 1, %s737_s15   ;;  %s97_s19 = sadd.s32 1, %s733_s14 }
   0x6   : > { %s94_s20 = ssub.s32 %s737_s15, %s786_s18  ;;  %p107_p0 = scmp.ne.s32.totalorder %s733_s14, %s729_s13 }
   0x7   : > { %p95_p1 = scmp.eq.s32.totalorder %s94_s20, 0  ;;  %p108_p2 = scmp.eq.s32.totalorder %s782_s16, 1 }
   0x8   : > { %p113_p3 = scmp.ne.s32.totalorder %s729_s13, %s725_s12  ;;  %p114_p4 = scmp.eq.s32.totalorder %s561_s17, 1 }
   0x9   : > { %s797_s21 = scalar_select %p95_p1, %s733_s14, %s97_s19  }
   0xa   : > { %p799_p5 = por %p108_p2, %p107_p0  ;;  %p803_p6 = por %p114_p4, %p113_p3 }
   0xb   : > { %p562_p7 = scmp.ge.s32.totalorder %s737_s15, 1  ;;  %p121_p8 = scmp.lt.s32.totalorder %s737_s15, 3 }
   0xc   : > { %p602_p9 = scmp.eq.s32.totalorder %s782_s16, 0  ;;  %s134_s27 = sshll.u32 %s975_s1, 4  ;;  %s135_s27 = int_to_ptr.vmem [resolvable:$true] %s134_s27 }
   0xd   : > { %p810_p10 = pnand %p562_p7, %p121_p8  ;;  %s658_s28 = scalar_lea.vmem %s135_s27, 16 }
   0xe   : > { %p659_p13 = scmp.ne.s32.totalorder %s135_s27, %s658_s28  ;;  %p666_p3 = scmp.lt.s32.totalorder %s135_s27, %s135_s27 }
   0xf   : > { %p594_p11 = pneg %p810_p10  ;;  %p667_p4 = scmp.lt.s32.totalorder %s658_s28, %s658_s28 }
  0x11   : > { %p595_p12 = pnand %p602_p9, %p594_p11  ;;  %p668_p7 = por %p667_p4, %p666_p3 }
  0x13   : > { %p660_p0 = pneg %p595_p12 }
  0x15   : > { %p661_p1 = pnand %p660_p0, %p659_p13 }
  0x17   : > { %p662_p2 = pneg %p661_p1 }
  0x19   : > { %p669_p8 = pnand %p668_p7, %p662_p2 }
  0x1b   : > { %672 = shalt.err (!%p669_p8)
}
  0x1c   : > { %s739_s29 = smov [#allocation2]   ;;  %181 = sbr.rel (%p810_p10) target bundleno = 471 (0x1d7), region = 32 }
  0x1d   : > { %597 = dma.vmem_to_smem (!%p595_p12), %s135_s27, 16, %s739_s29, [#allocation4]  }
  0x21   : > { %716 = dma.done.wait (%p602_p9), [#allocation4], 16  }
  0x22   : > { %718 = vsyncadd (%p602_p9), [#allocation4], 4294967280 }
  0x23   : > { %187 = sfence }
  0x24   : > { %s568_s30 = sshll.u32 %s782_s16, 1  ;;  %v251_v0 = vlaneseq  ;;  %vm268_vm2 = vcmask 523264   ;;  %s572_s8 = sld [smem:[#allocation2 + $0x1]]  ;;  %vm427_vm15 = vcmask 7168  }
  0x25   : > { %p224_p11 = scmp.lt.s32.totalorder %s568_s30, 2  ;;  %s340_s9 = sld [smem:[#allocation2]] }
  0x26   : > { %v828_v1 = vand.u32 127, %v251_v0  ;;  %s573_s20 = sld [smem:[#allocation2 + $0x2]]  ;;  %s575_s25 = sshll.u32 %s782_s16, 4  ;;  %v868_v33 = vshrl.u32 %v251_v0, 7 }
  0x27   : > { %s986_s30 = smov (!%p224_p11, %s568_s30), 2  ;;  %s574_s24 = sld [smem:[#allocation2 + $0x3]]  ;;  %v418_v36 = vstv %s575_s25 }
  0x28   : > { %v257_v2 = vand.u32 3, %v828_v1  ;;  %s571_s4 = sshll.u32 %s986_s30, 2  ;;  %s569_s10 = sshll.u32 %s986_s30, 3  ;;  %v417_v37 = vadd.s32 8, %v868_v33  ;;  %v876_v38 = vadd.s32 %v418_v36, %v868_v33 }
  0x29   : > { %s241_s7 = scalar_lea.vmem %s976_s2, %s571_s4  ;;  %s227_s19 = scalar_lea.vmem %s974_s0, %s569_s10 }
  0x2a   : > { %v581_v3 = vld [vmem:[%s241_s7] sm:$0xff]   ;;  %vm275_vm0 = vcmp.eq.s32.totalorder %v257_v2, 1  ;;  %vm265_vm1 = vcmp.eq.s32.totalorder %v257_v2, 0  ;;  %vm284_vm3 = vcmp.eq.s32.totalorder %v257_v2, 2  ;;  %vm293_vm4 = vcmp.eq.s32.totalorder %v257_v2, 3  ;;  %v851_v23 = vld [vmem:[%s227_s19 + $0x8] sm:$0xff] }
  0x2b   : > { %v582_v4 = vunpack.c.l.bf16 %v581_v3  ;;  %v583_v5 = vunpack.c.h.bf16 %v581_v3  ;;  %v849_v22 = vld [vmem:[%s227_s19] sm:$0xff]  ;;  %v361_v24 = vstv %s572_s8  ;;  %v341_v25 = vstv %s340_s9  ;;  %s216_s26 = sand.u32 1, %s729_s13   ;;  %s577_s28 = sshll.u32 %s782_s16, 7 }
  0x2c   : > { %vm354_vm5 = vcmp.eq.s32.totalorder %v849_v22, 1  ;;  %vm334_vm6 = vcmp.eq.s32.totalorder %v849_v22, 0  ;;  %vm355_vm7 = vcmp.eq.s32.totalorder %v851_v23, 1  ;;  %vm335_vm8 = vcmp.eq.s32.totalorder %v851_v23, 0  ;;  %s567_s27 = sshll.u32 %s216_s26, 3  ;;  %s939_s8 = scalar_lea.hbm %s977_s3, %s577_s28 }
  0x2d   : > { %v276_v6 = vsel %vm275_vm0, %v582_v4, 0.0  ;;  %v266_v7 = vsel %vm265_vm1, %v582_v4, 0.0  ;;  %v277_v8 = vsel %vm275_vm0, %v583_v5, 0.0  ;;  %v267_v9 = vsel %vm265_vm1, %v583_v5, 0.0  ;;  %s218_s30 = scalar_lea.vmem [#allocation5], %s567_s27  ;;  %s465_s9 = scalar_lea.sflag [#allocation3], %s216_s26 }
  0x2e   : > { %v278_v10 = vsel %vm268_vm2, %v276_v6, 0.0  ;;  %v269_v11 = vsel %vm268_vm2, %v266_v7, 0.0  ;;  %v281_v12 = vsel %vm268_vm2, %v277_v8, 0.0  ;;  %v272_v13 = vsel %vm268_vm2, %v267_v9, 0.0  ;;  %s478_s4 = sshll.u32 %s218_s30, 4  ;;  %s740_s10 = smov [#allocation5]   ;;  %s479_s4 = int_to_ptr.vmem [resolvable:$true] %s478_s4 }
  0x2f   : > { %279 = vadd.xlane.f32.xlu1 %v278_v10  ;;  %270 = vadd.xlane.f32.xlu0 %v269_v11  ;;  %v286_v14 = vsel %vm284_vm3, %v583_v5, 0.0  ;;  %v285_v15 = vsel %vm284_vm3, %v582_v4, 0.0  ;;  %v295_v18 = vsel %vm293_vm4, %v583_v5, 0.0  ;;  %v294_v19 = vsel %vm293_vm4, %v582_v4, 0.0  ;;  %s673_s16 = scalar_lea.vmem %s479_s4, 128  ;;  %s677_s11 = sshll.u32 %s740_s10, 4  ;;  %s678_s11 = int_to_ptr.vmem [resolvable:$false] %s677_s11 }
  0x30   : > { %v290_v16 = vsel %vm268_vm2, %v286_v14, 0.0  ;;  %v287_v17 = vsel %vm268_vm2, %v285_v15, 0.0  ;;  %v299_v20 = vsel %vm268_vm2, %v295_v18, 0.0  ;;  %v296_v21 = vsel %vm268_vm2, %v294_v19, 0.0  ;;  %p674_p9 = scmp.ne.s32.totalorder %s479_s4, %s673_s16  ;;  %s679_s17 = scalar_lea.vmem %s678_s11, 256 }
  0x31   : > { %v362_v26 = vsel %vm354_vm5, %v361_v24, 0.0  ;;  %v342_v27 = vsel %vm334_vm6, %v341_v25, 0.0  ;;  %v363_v28 = vsel %vm355_vm7, %v361_v24, 0.0  ;;  %v343_v29 = vsel %vm335_vm8, %v341_v25, 0.0  ;;  %p680_p13 = scmp.lt.s32.totalorder %s479_s4, %s678_s11  ;;  %p681_p0 = scmp.lt.s32.totalorder %s679_s17, %s673_s16 }
  0x32   : > { %v381_v30 = vstv %s573_s20  ;;  %vm375_vm9 = vcmp.eq.s32.totalorder %v851_v23, 2  ;;  %v364_v31 = vadd.f32 %v362_v26, %v342_v27  ;;  %v365_v32 = vadd.f32 %v363_v28, %v343_v29  ;;  %p675_p10 = pnand %p674_p9, %p799_p5 }
  0x33   : > { %282 = vadd.xlane.f32.xlu1 %v281_v12  ;;  %273 = vadd.xlane.f32.xlu0 %v272_v13  ;;  %vm374_vm10 = vcmp.eq.s32.totalorder %v849_v22, 2  ;;  %v383_v34 = vsel %vm375_vm9, %v381_v30, 0.0  ;;  %v878_v41 = vadd.s32 %v418_v36, %v417_v37  ;;  %vm395_vm11 = vcmp.eq.s32.totalorder %v851_v23, 3  ;;  %p682_p1 = por %p681_p0, %p680_p13 }
  0x34   : > { %v382_v35 = vsel %vm374_vm10, %v381_v30, 0.0  ;;  %v385_v40 = vadd.f32 %v383_v34, %v365_v32  ;;  %vm394_vm12 = vcmp.eq.s32.totalorder %v849_v22, 3  ;;  %v401_v42 = vstv %s574_s24  ;;  %p676_p12 = pneg %p675_p10 }
  0x35   : > { %v384_v39 = vadd.f32 %v382_v35, %v364_v31  ;;  %v402_v43 = vsel %vm394_vm12, %v401_v42, 0.0  ;;  %v403_v44 = vsel %vm395_vm11, %v401_v42, 0.0  ;;  %vm421_vm13 = vcmp.lt.s32.totalorder %v876_v38, 20 }
  0x36   : > { %vm422_vm14 = vcmp.lt.s32.totalorder %v878_v41, 20  ;;  %v890_v46 = vadd.f32 %v403_v44, %v385_v40  ;;  %vm454_vm0 = vcmp.eq.s32.totalorder %v868_v33, 0  ;;  %vm457_vm1 = vcmp.eq.s32.totalorder %v828_v1, 1  ;;  %p683_p2 = pnand %p682_p1, %p676_p12 }
  0x37   : > { %291 = vadd.xlane.f32.xlu1 %v290_v16  ;;  %288 = vadd.xlane.f32.xlu0 %v287_v17  ;;  %v888_v45 = vadd.f32 %v402_v43, %v384_v39  ;;  %vm455_vm2 = vcmp.eq.s32.totalorder %v828_v1, 0  ;;  %vm458_vm3 = vmand %vm454_vm0, %vm457_vm1 }
  0x38   : > { %v441_v48 = vsel %vm422_vm14, %v890_v46, 0.0  ;;  %vm456_vm4 = vmand %vm454_vm0, %vm455_vm2 }
  0x39   : > { %v440_v47 = vsel %vm421_vm13, %v888_v45, 0.0  ;;  %v443_v50 = vsel %vm427_vm15, %v441_v48, 0.0 }
  0x3a   : > { %v442_v49 = vsel %vm427_vm15, %v440_v47, 0.0 }
  0x3b   : > { %300 = vadd.xlane.f32.xlu1 %v299_v20  ;;  %297 = vadd.xlane.f32.xlu0 %v296_v21  ;;  %v444_v51 = vadd.f32 %v443_v50, %v442_v49 }
  0x3f   : > { %445 = vadd.xlane.f32.xlu1 %v444_v51 }
  0xb8   : > { %v280_v52 = vpop.xlane.xlu1 %279  ;;  %v271_v53 = vpop.xlane.xlu0 %270 }
  0xb9   : > { %v312_v56 = vmul.f32 0.0625, %v280_v52  ;;  %v310_v57 = vmul.f32 0.0625, %v271_v53 }
  0xbb   : > { %v318_v0 = vmax.f32 %v310_v57, %v312_v56  ;;  %v356_v52 = vsel %vm354_vm5, %v312_v56, 0.0  ;;  %v336_v53 = vsel %vm334_vm6, %v310_v57, 0.0 }
  0xbc   : > { %v283_v54 = vpop.xlane.xlu1 %282  ;;  %v274_v55 = vpop.xlane.xlu0 %273 }
  0xbd   : > { %v313_v58 = vmul.f32 0.0625, %v283_v54  ;;  %v311_v59 = vmul.f32 0.0625, %v274_v55 }
  0xbf   : > { %v319_v2 = vmax.f32 %v311_v59, %v313_v58  ;;  %v357_v48 = vsel %vm355_vm7, %v313_v58, 0.0  ;;  %v337_v49 = vsel %vm335_vm8, %v311_v59, 0.0 }
  0xc0   : > { %v292_v60 = vpop.xlane.xlu1 %291  ;;  %v289_v61 = vpop.xlane.xlu0 %288  ;;  %v359_v51 = vadd.f32 %v357_v48, %v337_v49 }
  0xc1   : > { %v315_v62 = vmul.f32 0.0625, %v292_v60  ;;  %v314_v63 = vmul.f32 0.0625, %v289_v61  ;;  %v358_v60 = vadd.f32 %v356_v52, %v336_v53 }
  0xc3   : > { %v321_v5 = vmax.f32 %v319_v2, %v315_v62  ;;  %v320_v6 = vmax.f32 %v318_v0, %v314_v63  ;;  %v377_v50 = vsel %vm375_vm9, %v315_v62, 0.0 }
  0xc4   : > { %v301_v3 = vpop.xlane.xlu1 %300  ;;  %v298_v4 = vpop.xlane.xlu0 %297  ;;  %v379_v55 = vadd.f32 %v377_v50, %v359_v51 }
  0xc5   : > { %v317_v7 = vmul.f32 0.0625, %v301_v3  ;;  %v316_v8 = vmul.f32 0.0625, %v298_v4 }
  0xc7   : > { %v323_v9 = vmax.f32 %v321_v5, %v317_v7  ;;  %v900_v10 = vmax.f32 %v320_v6, %v316_v8  ;;  %v397_v54 = vsel %vm395_vm11, %v317_v7, 0.0  ;;  %v396_v61 = vsel %vm394_vm12, %v316_v8, 0.0 }
  0xc9   : > { %v327_v11 = vsub.f32 %v311_v59, %v323_v9  ;;  %v347_v12 = vsub.f32 %v313_v58, %v323_v9  ;;  %v367_v13 = vsub.f32 %v315_v62, %v323_v9  ;;  %v387_v14 = vsub.f32 %v317_v7, %v323_v9 }
  0xca   : > { %v326_v15 = vsub.f32 %v310_v57, %v900_v10  ;;  %v346_v16 = vsub.f32 %v312_v56, %v900_v10  ;;  %v366_v21 = vsub.f32 %v314_v63, %v900_v10  ;;  %v386_v26 = vsub.f32 %v316_v8, %v900_v10 }
  0xcb   : > { %v330_v17 = vmul.f32 1.442695, %v327_v11  ;;  %v350_v18 = vmul.f32 1.442695, %v347_v12  ;;  %v370_v19 = vmul.f32 1.442695, %v367_v13  ;;  %v399_v59 = vadd.f32 %v397_v54, %v379_v55  ;;  %v446_v13 = vpop.xlane.xlu1 %445 }
  0xcc   : > { %v390_v20 = vmul.f32 1.442695, %v387_v14  ;;  %v328_v24 = vmul.f32 1.442695, %v326_v15  ;;  %v348_v25 = vmul.f32 1.442695, %v346_v16 }
  0xcd   : > { %638 = vpow2.f32 %v330_v17  ;;  %v368_v27 = vmul.f32 1.442695, %v366_v21  ;;  %v388_v28 = vmul.f32 1.442695, %v386_v26  ;;  %v376_v58 = vsel %vm374_vm10, %v314_v63, 0.0 }
  0xce   : > { %640 = vpow2.f32 %v350_v18  ;;  %v378_v62 = vadd.f32 %v376_v58, %v358_v60  ;;  %v407_v2 = vsub.f32 %v323_v9, %v399_v59 }
  0xcf   : > { %642 = vpow2.f32 %v370_v19 }
  0xd0   : > { %644 = vpow2.f32 %v390_v20  ;;  %v398_v3 = vadd.f32 %v396_v61, %v378_v62 }
  0xd1   : > { %646 = vpow2.f32 %v328_v24 }
  0xd2   : > { %648 = vpow2.f32 %v348_v25  ;;  %v406_v57 = vsub.f32 %v900_v10, %v398_v3  ;;  %v447_v10 = vrot.slane %v446_v13, 4 }
  0xd3   : > { %650 = vpow2.f32 %v368_v27 }
  0xd4   : > { %652 = vpow2.f32 %v388_v28  ;;  %v448_v14 = vadd.f32 %v447_v10, %v446_v13 }
  0xda   : > { %v639_v29 = vpop.eup %638 }
  0xdb   : > { %v641_v30 = vpop.eup %640 }
  0xdc   : > { %v643_v31 = vpop.eup %642  ;;  %v353_v32 = vadd.f32 %v641_v30, %v639_v29 }
  0xdd   : > { %v645_v34 = vpop.eup %644 }
  0xde   : > { %v647_v35 = vpop.eup %646  ;;  %v373_v36 = vadd.f32 %v643_v31, %v353_v32 }
  0xdf   : > { %v649_v37 = vpop.eup %648 }
  0xe0   : > { %v352_v39 = vadd.f32 %v649_v37, %v647_v35  ;;  %v393_v40 = vadd.f32 %v645_v34, %v373_v36  ;;  %v651_v42 = vpop.eup %650 }
  0xe1   : > { %v653_v44 = vpop.eup %652 }
  0xe2   : > { %v372_v43 = vadd.f32 %v651_v42, %v352_v39  ;;  %654 = vlog2.f32 %v393_v40 }
  0xe4   : > { %v392_v47 = vadd.f32 %v653_v44, %v372_v43 }
  0xe6   : > { %656 = vlog2.f32 %v392_v47 }
  0xef   : > { %v655_v0 = vpop.eup %654 }
  0xf0   : > { %v411_v56 = vmul.f32 0.6931472, %v655_v0 }
  0xf2   : > { %v413_v4 = vadd.f32 %v411_v56, %v407_v2 }
  0xf3   : > { %v657_v5 = vpop.eup %656 }
  0xf4   : > { %v409_v23 = vmul.f32 0.6931472, %v657_v5  ;;  %v424_v6 = vmul.f32 %v413_v4, %v890_v46  ;;  %v449_v46 = vrot.slane %v448_v14, 2 }
  0xf6   : > { %v412_v7 = vadd.f32 %v409_v23, %v406_v57  ;;  %v426_v63 = vsel %vm422_vm14, %v424_v6, 0.0  ;;  %v450_v17 = vadd.f32 %v449_v46, %v448_v14 }
  0xf7   : > { %v429_v22 = vsel %vm427_vm15, %v426_v63, 0.0 }
  0xf8   : > { %v423_v11 = vmul.f32 %v412_v7, %v888_v45  ;;  %v451_v19 = vrot.slane %v450_v17, 1 }
  0xfa   : > { %v425_v8 = vsel %vm421_vm13, %v423_v11, 0.0  ;;  %v452_v21 = vadd.f32 %v451_v19, %v450_v17 }
  0xfb   : > { %v428_v9 = vsel %vm427_vm15, %v425_v8, 0.0 }
  0xfc   : > { %v430_v12 = vadd.f32 %v429_v22, %v428_v9 }
  0xfe   : > { %431 = vadd.xlane.f32.xlu0 %v430_v12 }
 0x187   : > { %v432_v15 = vpop.xlane.xlu0 %431 }
 0x188   : > { %v433_v16 = vrot.slane %v432_v15, 4 }
 0x18a   : > { %v434_v41 = vadd.f32 %v433_v16, %v432_v15 }
 0x18c   : > { %v435_v45 = vrot.slane %v434_v41, 2 }
 0x18e   : > { %v436_v18 = vadd.f32 %v435_v45, %v434_v41 }
 0x190   : > { %v437_v20 = vrot.slane %v436_v18, 1 }
 0x192   : > { %v438_v38 = vadd.f32 %v437_v20, %v436_v18 }
 0x194   : > { %584 = vpush %v438_v38 }
 0x195   : > { %586 = vpush %v452_v21 }
 0x1c5   : > { %s585_s29 = spop %584 }
 0x1c6   : > { %v461_v24 = vstv %s585_s29  ;;  %s587_s5 = spop %586 }
 0x1c7   : > { %v459_v25 = vstv %s587_s5 }
 0x1c8   : > { %v460_v26 = vsel %vm458_vm3, %v459_v25, 0.0 }
 0x1c9   : > { %v462_v33 = vsel %vm456_vm4, %v461_v24, %v460_v26 }
 0x1ca   : > { %463 = vst [vmem:[%s218_s30] sm:$0xff] %v462_v33 }
 0x1cb   : > { %686 = shalt.err (!%p683_p2)
}
 0x1cc   : > { %s687_s19 = scalar_lea.hbm %s939_s8, 128  ;;  %s691_s25 = scalar_lea.hbm %s977_s3, 256 }
 0x1cd   : > { %p688_p3 = scmp.ne.s32.totalorder %s939_s8, %s687_s19  ;;  %p692_p8 = scmp.lt.s32.totalorder %s939_s8, %s977_s3 }
 0x1ce   : > { %p693_p11 = scmp.lt.s32.totalorder %s691_s25, %s687_s19 }
 0x1cf   : > { %p689_p4 = pnand %p688_p3, %p799_p5 }
 0x1d0   : > { %p694_p9 = por %p693_p11, %p692_p8 }
 0x1d1   : > { %p690_p7 = pneg %p689_p4 }
 0x1d3   : > { %p695_p10 = pnand %p694_p9, %p690_p7 }
 0x1d5   : > { %698 = shalt.err (!%p695_p10)
}
 0x1d6   : > { %592 = dma.vmem_to_hbm [thread:$0]  (%p799_p5), %s479_s4, 128, %s939_s8, %s465_s9  }
 0x1d7 PF: > { %p604_p12 = scmp.ge.s32.totalorder %s737_s15, 2  ;;  %s490_s28 = sand.u32 1, %s725_s12  }
 0x1d8   : > { %s491_s29 = scalar_lea.sflag [#allocation3], %s490_s28 }
 0x1d9   : > { %p599_p13 = pnand %p604_p12, %p803_p6 }
 0x1db   : > { %p600_p0 = pneg %p599_p13 }
 0x1dd   : > { %720 = dma.done.wait (%p600_p0), %s491_s29, 128  }
 0x1de   : > { %722 = vsyncadd (%p600_p0), %s491_s29, 4294967168  ;;  %p14_p1 = scmp.ge.s32.totalorder %s786_s18, 4   ;;  %s981_s12 = smov %s729_s13 }
 0x1df   : > { %s982_s13 = smov %s733_s14  ;;  %s983_s14 = smov %s797_s21 }
 0x1e0   : > { %s984_s15 = smov %s786_s18  ;;  %16 = sbr.rel (!%p14_p1) target bundleno = 4 (0x4), region = 75 }
 0x1e5   :  { %496 = vsyncpa [#allocation3], 1 }
 0x1e6   :  { %498 = vsyncpa [#allocation3 + $0x1], 1 }
 0x1e7   :  { %499 = vsyncpa [#allocation4], 1 }
 0x1e8   :  { %501 = vsyncpa [#allocation4 + $0x1], 1 }

</bundles_post_ra>
